<compile_context>
chip_gen: v7x
topology: tpu7x:2x2x1
jax: 0.10.0
libtpu: 0.0.40
codegen_flags: <defaults>
</compile_context>

<pallas_src>
import jax
import jax.numpy as jnp
from jax.experimental import pallas as pl
from jax.experimental.pallas import tpu as pltpu

# Logical (PyTorch) dims.
D_IN, D1, D2, D3, D_OUT = 100, 200, 400, 128, 400


def fused_mlp_kernel(x_ref, w_ref, b_ref, o_ref):
    # Single MXU matmul with f32 accumulation; bias added in f32 afterwards.
    acc = jnp.dot(x_ref[...], w_ref[...], preferred_element_type=jnp.float32)
    o_ref[...] = (acc + b_ref[...]).astype(o_ref.dtype)


def fuse_params(params):
    """Collapse the 4 affine layers into one (100, 400) weight + (1, 400) bias.

    Done once, outside the kernel (plain XLA ops on tiny matrices). Kept in f32:
    the kernel is HBM-bound, so the f32 matmul is free and avoids bf16 error.
    """
    (w1, b1), (w2, b2), (w3, b3), (w4, b4) = params
    w_eff = w1 @ w2 @ w3 @ w4                                  # (100, 400) f32
    b_eff = ((b1 @ w2 + b2) @ w3 + b3) @ w4 + b4               # (1, 400)  f32
    return w_eff, b_eff


def _pick_tb(batch, max_tb=1024):
    """Batch-tile size: <= max_tb rows, multiple of 8, and an even tile count
    (>= 2) whenever the batch is big enough, so the 'parallel' grid axis can
    shard evenly across the 2 TensorCores on v7x."""
    if batch <= 64:
        return batch                       # single tile; block dim == full batch
    n_tiles = max(2, pl.cdiv(batch, max_tb))
    if n_tiles % 2:
        n_tiles += 1                       # even count -> balanced across 2 TCs
    return ((pl.cdiv(batch, n_tiles) + 7) // 8) * 8


def meta_forward(x, fused_params, *, tb=None):
    """x: (B, 100) float32. fused_params: output of fuse_params()."""
    w_eff, b_eff = fused_params
    B, d_in = x.shape
    d_out = w_eff.shape[1]

    if tb is None:
        tb = _pick_tb(B)
    n_tiles = pl.cdiv(B, tb)
    b_pad = n_tiles * tb
    if b_pad != B:
        # Single pad pass, batch axis only (no feature pad, no dtype cast).
        x = jnp.pad(x, ((0, b_pad - B), (0, 0)))

    out = pl.pallas_call(
        fused_mlp_kernel,
        out_shape=jax.ShapeDtypeStruct((b_pad, d_out), jnp.float32),
        grid=(n_tiles,),
        in_specs=[
            # Batch-streamed activations (pipelined); last dim == full array dim.
            pl.BlockSpec((tb, d_in), lambda i: (i, 0)),
            # Fused weight: constant index_map -> VMEM-resident, no re-DMA.
            pl.BlockSpec((d_in, d_out), lambda i: (0, 0)),
            # Fused bias (f32), full-array block.
            pl.BlockSpec((1, d_out), lambda i: (0, 0)),
        ],
        # Logical-width (400) output: no post-kernel slice pass, no padded lanes
        # stored to HBM (only the final 16-lane sliver of each row is masked).
        out_specs=pl.BlockSpec((tb, d_out), lambda i: (i, 0)),
        compiler_params=pltpu.CompilerParams(
            dimension_semantics=("parallel",),
        ),
    )(x, w_eff, b_eff)

    return out[:B] if b_pad != B else out


def init_linear(key, fan_in, fan_out):
    """Deterministic init mimicking PyTorch nn.Linear default (uniform ±1/sqrt(fan_in)).
    W stored as (fan_in, fan_out) (transpose of torch layout), b as (1, fan_out)."""
    kw, kb = jax.random.split(key)
    bound = 1.0 / jnp.sqrt(jnp.float32(fan_in))
    w = jax.random.uniform(kw, (fan_in, fan_out), jnp.float32, -bound, bound)
    b = jax.random.uniform(kb, (1, fan_out), jnp.float32, -bound, bound)
    return w, b


if __name__ == "__main__":
    key = jax.random.PRNGKey(0)
    k_x, k1, k2, k3, k4 = jax.random.split(key, 5)

    # Demo batch: 512 rows -> 2 tiles of 256 (uses both TensorCores on v7x).
    B = 512
    x = jax.random.normal(k_x, (B, D_IN), jnp.float32)

    params = [
        init_linear(k1, D_IN, D1),
        init_linear(k2, D1, D2),
        init_linear(k3, D2, D3),
        init_linear(k4, D3, D_OUT),
    ]

    # TODO(synk): the offline 4-layer fusion is only valid while the chain is
    # purely affine; any activation/dropout inserted between layers breaks it.
    fused = fuse_params(params)
    out = meta_forward(x, fused)
    out = jax.block_until_ready(out)

    # Pure-JAX f32 layer-by-layer reference of the original module.
    ref = x
    for w, b in params:
        ref = ref @ w + b

    assert out.shape == (B, D_OUT)
    # All-f32 path: only accumulation-order differences from the offline fusion.
    assert jnp.allclose(out, ref, atol=2e-3, rtol=2e-3), (
        float(jnp.max(jnp.abs(out - ref)))
    )

    print("KERNEL_OK")
</pallas_src>

<mosaic_0001>
module attributes {stable_mosaic.version = 11 : i64} {
  func.func @fused_mlp_kernel(%arg0: i32, %arg1: memref<256x100xf32, #tpu.memory_space<vmem>>, %arg2: memref<100x400xf32, #tpu.memory_space<vmem>>, %arg3: memref<1x400xf32, #tpu.memory_space<vmem>>, %arg4: memref<256x400xf32, #tpu.memory_space<vmem>>) attributes {dimension_semantics = [#tpu.dimension_semantics<parallel>], iteration_bounds = array<i64: 2>, scalar_prefetch = 0 : i64, scratch_operands = 0 : i64, tpu.core_type = #tpu.core_type<tc>, window_params = [{transform_indices = @transform_0, window_bounds = array<i64: 256, 100>}, {pipeline_mode = #tpu.pipeline_mode<synchronous>, transform_indices = @transform_1, window_bounds = array<i64: 100, 400>}, {pipeline_mode = #tpu.pipeline_mode<synchronous>, transform_indices = @transform_2, window_bounds = array<i64: 1, 400>}, {transform_indices = @transform_3, window_bounds = array<i64: 256, 400>}]} {
    %c0 = arith.constant 0 : index
    %c0_0 = arith.constant 0 : index
    %0 = vector.load %arg1[%c0, %c0_0] : memref<256x100xf32, #tpu.memory_space<vmem>>, vector<256x100xf32>
    %c0_1 = arith.constant 0 : index
    %c0_2 = arith.constant 0 : index
    %1 = vector.load %arg2[%c0_1, %c0_2] : memref<100x400xf32, #tpu.memory_space<vmem>>, vector<100x400xf32>
    %cst = arith.constant dense<0.000000e+00> : vector<256x400xf32>
    %2 = tpu.matmul %0, %1, %cst {dimension_numbers = #tpu.dot_dimension_numbers<[1], [0], [0], [1], [0, 0, 1, 1], [], []>} : vector<256x100xf32>, vector<100x400xf32>, vector<256x400xf32> -> vector<256x400xf32>
    %c0_3 = arith.constant 0 : index
    %c0_4 = arith.constant 0 : index
    %3 = vector.load %arg3[%c0_3, %c0_4] : memref<1x400xf32, #tpu.memory_space<vmem>>, vector<1x400xf32>
    %4 = vector.broadcast %3 : vector<1x400xf32> to vector<256x400xf32>
    %5 = arith.addf %2, %4 : vector<256x400xf32>
    %c0_5 = arith.constant 0 : index
    %c0_6 = arith.constant 0 : index
    %6 = vector.load %arg4[%c0_5, %c0_6] : memref<256x400xf32, #tpu.memory_space<vmem>>, vector<256x400xf32>
    tpu.vector_store %arg4[%c0_5, %c0_6], %5 {strides = array<i32>} : memref<256x400xf32, #tpu.memory_space<vmem>>, vector<256x400xf32>,
    return
  }
  func.func @transform_0(%arg0: i32) -> (i32, i32) {
    %c0_i32 = arith.constant 0 : i32
    %c0_i32_0 = arith.constant 0 : i32
    return %arg0, %c0_i32 : i32, i32
  }
  func.func @transform_1(%arg0: i32) -> (i32, i32) {
    %c0_i32 = arith.constant 0 : i32
    %c0_i32_0 = arith.constant 0 : i32
    %c0_i32_1 = arith.constant 0 : i32
    return %c0_i32, %c0_i32_0 : i32, i32
  }
  func.func @transform_2(%arg0: i32) -> (i32, i32) {
    %c0_i32 = arith.constant 0 : i32
    %c0_i32_0 = arith.constant 0 : i32
    %c0_i32_1 = arith.constant 0 : i32
    return %c0_i32, %c0_i32_0 : i32, i32
  }
  func.func @transform_3(%arg0: i32) -> (i32, i32) {
    %c0_i32 = arith.constant 0 : i32
    %c0_i32_0 = arith.constant 0 : i32
    return %arg0, %c0_i32 : i32, i32
  }
}

</mosaic_0001>

<bundles_post_ra>
// kernel: tpu_custom_call.1
= control target key start
LH: loop header
LB: loop body
LE: loop exit
PB: predicated region body
PF: predicated region fallthrough
CT: control target
= control target key end

     0   :  { %s1260_s12 = smov 0   ;;  %s1903_s0 = inlined_call_operand.vmem [shape: f32[512,100], index: 0, kind: input, shape index: {}]   ;;  %s1904_s1 = inlined_call_operand.vmem [shape: f32[100,400], index: 1, kind: input, shape index: {}]   ;;  %s1905_s2 = inlined_call_operand.vmem [shape: f32[1,400], index: 2, kind: input, shape index: {}]   ;;  %s1906_s3 = inlined_call_operand.vmem [shape: f32[512,400], index: 3, kind: output, shape index: {}]  }
   0x1 LB: > { %s1093_s13 = sadd.s32 4294967295, %s1237_s12   ;;  %p1097_p0 = scmp.ge.s32.totalorder %s1237_s12, 1  ;;  %s1237_s12 = sphi %s1260_s12, %s13_s12  }
   0x2   : > { %p138_p1 = scmp.lt.s32.totalorder %s1237_s12, 3 }
   0x4   : > { %p139_p2 = pnand %p1097_p0, %p138_p1 }
   0x5   : > { %v209_v0 = vld [vmem:[%s1904_s1 + $0x8] sm:$0xff] (!%p139_p2)  ;;  %v211_v2 = vld [vmem:[%s1904_s1 + $0x18] sm:$0xff] (!%p139_p2)  ;;  %v208_v5 = vld [vmem:[%s1904_s1] sm:$0xff] (!%p139_p2)  ;;  %v1239_v7 = vmov (!%p139_p2), 0.0   ;;  %s1098_s24 = sshll.u32 (!%p139_p2), %s1093_s13, 5  ;;  %vm379_vm0 = vcmask (!%p139_p2), 1043456  }
   0x6   : > { %142 = sbr.rel (%p139_p2) target bundleno = 376 (0x178), region = 32  ;;  %v213_v1 = vld [vmem:[%s1904_s1 + $0x28] sm:$0xff] (!%p139_p2)  ;;  %v215_v4 = vld [vmem:[%s1904_s1 + $0x38] sm:$0xff] (!%p139_p2)  ;;  %v212_v6 = vld [vmem:[%s1904_s1 + $0x20] sm:$0xff] (!%p139_p2)  ;;  %456 = vmatprep.mubr.f32.mxu0 (!%p139_p2), %v1239_v7  ;;  %713 = vmatprep.mubr.f32.mxu1 (!%p139_p2), %v1239_v7  ;;  %p164_p3 = scmp.lt.s32.totalorder (!%p139_p2), %s1098_s24, 63  ;;  %vm282_vm1 = vcmask (!%p139_p2), 818176  }
   0x7   : > { %v1174_v3 = vpack.c.bf16 (!%p139_p2), %v213_v1, %v209_v0  ;;  %v1198_v8 = vpack.c.bf16 (!%p139_p2), %v215_v4, %v211_v2  ;;  %v1176_v9 = vpack.c.bf16 (!%p139_p2), %v212_v6, %v208_v5  ;;  %v210_v10 = vld [vmem:[%s1904_s1 + $0x10] sm:$0xff] (!%p139_p2)  ;;  %v217_v12 = vld [vmem:[%s1904_s1 + $0x48] sm:$0xff] (!%p139_p2)  ;;  %v219_v15 = vld [vmem:[%s1904_s1 + $0x58] sm:$0xff] (!%p139_p2)  ;;  %vm909_vm2 = vcmask (!%p139_p2), 130048  }
   0x8   : > { %v214_v11 = vld [vmem:[%s1904_s1 + $0x30] sm:$0xff] (!%p139_p2)  ;;  %v221_v14 = vld [vmem:[%s1904_s1 + $0x68] sm:$0xff] (!%p139_p2)  ;;  %v223_v16 = vld [vmem:[%s1904_s1 + $0x78] sm:$0xff] (!%p139_p2) }
   0x9   : > { %1175 = vmatprep.subr.bf16.mxu0 (!%p139_p2), %v1174_v3  ;;  %v1200_v13 = vpack.c.bf16 (!%p139_p2), %v214_v11, %v210_v10  ;;  %1199 = vmatprep.subr.bf16.mxu1 (!%p139_p2), %v1198_v8  ;;  %v1178_v17 = vpack.c.bf16 (!%p139_p2), %v221_v14, %v217_v12  ;;  %v1202_v18 = vpack.c.bf16 (!%p139_p2), %v223_v16, %v219_v15  ;;  %v216_v19 = vld [vmem:[%s1904_s1 + $0x40] sm:$0xff] (!%p139_p2)  ;;  %v218_v21 = vld [vmem:[%s1904_s1 + $0x50] sm:$0xff] (!%p139_p2)  ;;  %v225_v24 = vld [vmem:[%s1904_s1 + $0x88] sm:$0xff] (!%p139_p2) }
   0xa   : > { %1177 = vmatpush1.bf16.msra.mxu0 (!%p139_p2), %v1176_v9  ;;  %v220_v20 = vld [vmem:[%s1904_s1 + $0x60] sm:$0xff] (!%p139_p2)  ;;  %v222_v23 = vld [vmem:[%s1904_s1 + $0x70] sm:$0xff] (!%p139_p2)  ;;  %v229_v25 = vld [vmem:[%s1904_s1 + $0xa8] sm:$0xff] (!%p139_p2) }
   0xb   : > { %1201 = vmatpush1.bf16.msra.mxu1 (!%p139_p2), %v1200_v13  ;;  %v1180_v22 = vpack.c.bf16 (!%p139_p2), %v220_v20, %v216_v19  ;;  %1179 = vmatprep.subr.bf16.mxu0 (!%p139_p2), %v1178_v17  ;;  %v1204_v26 = vpack.c.bf16 (!%p139_p2), %v222_v23, %v218_v21  ;;  %v1182_v27 = vpack.c.bf16 (!%p139_p2), %v229_v25, %v225_v24  ;;  %v227_v28 = vld [vmem:[%s1904_s1 + $0x98] sm:$0xff] (!%p139_p2)  ;;  %v224_v30 = vld [vmem:[%s1904_s1 + $0x80] sm:$0xff] (!%p139_p2)  ;;  %v226_v33 = vld [vmem:[%s1904_s1 + $0x90] sm:$0xff] (!%p139_p2) }
   0xc   : > { %1203 = vmatprep.subr.bf16.mxu1 (!%p139_p2), %v1202_v18  ;;  %v231_v29 = vld [vmem:[%s1904_s1 + $0xb8] sm:$0xff] (!%p139_p2)  ;;  %v228_v32 = vld [vmem:[%s1904_s1 + $0xa0] sm:$0xff] (!%p139_p2)  ;;  %v230_v34 = vld [vmem:[%s1904_s1 + $0xb0] sm:$0xff] (!%p139_p2) }
   0xd   : > { %v1206_v31 = vpack.c.bf16 %v231_v29, %v227_v28  ;;  %v1184_v35 = vpack.c.bf16 %v228_v32, %v224_v30  ;;  %v233_v36 = vld [vmem:[%s1904_s1 + $0xc8] sm:$0xff]  ;;  %v235_v38 = vld [vmem:[%s1904_s1 + $0xd8] sm:$0xff]  ;;  %v1208_v39 = vpack.c.bf16 %v230_v34, %v226_v33  ;;  %v232_v42 = vld [vmem:[%s1904_s1 + $0xc0] sm:$0xff]  ;;  %s1908_s24 = smov (!%p164_p3, %s1098_s24), 63 }
   0xe   : > { %1181 = vmatpush1.bf16.msra.mxu0 %v1180_v22  ;;  %v237_v37 = vld [vmem:[%s1904_s1 + $0xe8] sm:$0xff]  ;;  %v239_v41 = vld [vmem:[%s1904_s1 + $0xf8] sm:$0xff]  ;;  %v236_v43 = vld [vmem:[%s1904_s1 + $0xe0] sm:$0xff]  ;;  %s1099_s8 = sshll.u32 %s1908_s24, 3  ;;  %s1173_s25 = sshll.u32 %s1908_s24, 5 }
   0xf   : > { %1205 = vmatpush1.bf16.msra.mxu1 %v1204_v26  ;;  %1183 = vmatprep.subr.bf16.mxu0 %v1182_v27  ;;  %v1186_v40 = vpack.c.bf16 %v237_v37, %v233_v36  ;;  %v1210_v44 = vpack.c.bf16 %v239_v41, %v235_v38  ;;  %v234_v45 = vld [vmem:[%s1904_s1 + $0xd0] sm:$0xff]  ;;  %v241_v47 = vld [vmem:[%s1904_s1 + $0x108] sm:$0xff]  ;;  %v243_v49 = vld [vmem:[%s1904_s1 + $0x118] sm:$0xff]  ;;  %v1188_v51 = vpack.c.bf16 %v236_v43, %v232_v42  ;;  %s1429_s17 = scalar_lea.vmem %s1903_s0, %s1099_s8  ;;  %s1610_s28 = scalar_lea.vmem %s1906_s3, %s1173_s25 }
  0x10   : > { %1207 = vmatprep.subr.bf16.mxu1 %v1206_v31  ;;  %v238_v46 = vld [vmem:[%s1904_s1 + $0xf0] sm:$0xff]  ;;  %v245_v48 = vld [vmem:[%s1904_s1 + $0x128] sm:$0xff]  ;;  %v247_v50 = vld [vmem:[%s1904_s1 + $0x138] sm:$0xff] }
  0x11   : > { %v1212_v52 = vpack.c.bf16 %v238_v46, %v234_v45  ;;  %v1190_v53 = vpack.c.bf16 %v245_v48, %v241_v47  ;;  %v240_v54 = vld [vmem:[%s1904_s1 + $0x100] sm:$0xff]  ;;  %v242_v56 = vld [vmem:[%s1904_s1 + $0x110] sm:$0xff]  ;;  %v1214_v57 = vpack.c.bf16 %v247_v50, %v243_v49  ;;  %v249_v59 = vld [vmem:[%s1904_s1 + $0x148] sm:$0xff]  ;;  %v262_v46 = vlaneseq }
  0x12   : > { %1185 = vmatpush1.bf16.msra.mxu0 %v1184_v35  ;;  %v244_v55 = vld [vmem:[%s1904_s1 + $0x120] sm:$0xff]  ;;  %v246_v58 = vld [vmem:[%s1904_s1 + $0x130] sm:$0xff]  ;;  %v253_v60 = vld [vmem:[%s1904_s1 + $0x168] sm:$0xff] }
  0x13   : > { %1209 = vmatpush1.bf16.msra.mxu1 %v1208_v39  ;;  %1187 = vmatprep.subr.bf16.mxu0 %v1186_v40  ;;  %v251_v61 = vld [vmem:[%s1904_s1 + $0x158] sm:$0xff]  ;;  %v1192_v63 = vpack.c.bf16 %v244_v55, %v240_v54  ;;  %v1216_v0 = vpack.c.bf16 %v246_v58, %v242_v56  ;;  %v1194_v1 = vpack.c.bf16 %v253_v60, %v249_v59  ;;  %v248_v2 = vld [vmem:[%s1904_s1 + $0x140] sm:$0xff]  ;;  %v250_v5 = vld [vmem:[%s1904_s1 + $0x150] sm:$0xff]  ;;  %v263_v47 = vshrl.u32 %v262_v46, 7 }
  0x14   : > { %1211 = vmatprep.subr.bf16.mxu1 %v1210_v44  ;;  %v255_v62 = vld [vmem:[%s1904_s1 + $0x178] sm:$0xff]  ;;  %v252_v3 = vld [vmem:[%s1904_s1 + $0x160] sm:$0xff]  ;;  %v254_v6 = vld [vmem:[%s1904_s1 + $0x170] sm:$0xff] }
  0x15   : > { %v1218_v4 = vpack.c.bf16 %v255_v62, %v251_v61  ;;  %v1196_v8 = vpack.c.bf16 %v252_v3, %v248_v2  ;;  %v1220_v9 = vpack.c.bf16 %v254_v6, %v250_v5  ;;  %v257_v10 = vld [vmem:[%s1904_s1 + $0x188] sm:$0xf]  ;;  %v259_v11 = vld [vmem:[%s1904_s1 + $0x198] sm:$0xf]  ;;  %v256_v12 = vld [vmem:[%s1904_s1 + $0x180] sm:$0xf] }
  0x16   : > { %1189 = vmatpush1.bf16.msra.mxu0 %v1188_v51  ;;  %v258_v13 = vld [vmem:[%s1904_s1 + $0x190] sm:$0xf]  ;;  %v176_v14 = vld [vmem:[%s1429_s17] sm:$0xff]  ;;  %v177_v15 = vld [vmem:[%s1429_s17 + $0x8] sm:$0xff]  ;;  %v264_v48 = vsub.s32 0, %v263_v47  ;;  %v272_v50 = vsub.s32 2, %v263_v47 }
  0x17   : > { %1213 = vmatpush1.bf16.msra.mxu1 %v1212_v52  ;;  %1191 = vmatprep.subr.bf16.mxu0 %v1190_v53  ;;  %v178_v16 = vld [vmem:[%s1429_s17 + $0x10] sm:$0xff]  ;;  %v179_v17 = vld [vmem:[%s1429_s17 + $0x18] sm:$0xff]  ;;  %v180_v18 = vld [vmem:[%s1429_s17 + $0x20] sm:$0xff]  ;;  %v268_v51 = vsub.s32 1, %v263_v47  ;;  %v276_v52 = vsub.s32 3, %v263_v47 }
  0x18   : > { %1215 = vmatprep.subr.bf16.mxu1 %v1214_v57  ;;  %v181_v19 = vld [vmem:[%s1429_s17 + $0x28] sm:$0xff]  ;;  %v182_v20 = vld [vmem:[%s1429_s17 + $0x30] sm:$0xff]  ;;  %v183_v21 = vld [vmem:[%s1429_s17 + $0x38] sm:$0xff] }
  0x19   : > { %v184_v22 = vld [vmem:[%s1429_s17 + $0x40] sm:$0xff]  ;;  %v185_v23 = vld [vmem:[%s1429_s17 + $0x48] sm:$0xff]  ;;  %v186_v24 = vld [vmem:[%s1429_s17 + $0x50] sm:$0xff] }
  0x1a   : > { %1193 = vmatpush1.bf16.msra.mxu0 %v1192_v63  ;;  %v187_v25 = vld [vmem:[%s1429_s17 + $0x58] sm:$0xff]  ;;  %v188_v26 = vld [vmem:[%s1429_s17 + $0x60] sm:$0xff]  ;;  %v189_v27 = vld [vmem:[%s1429_s17 + $0x68] sm:$0xff] }
  0x1b   : > { %1217 = vmatpush1.bf16.msra.mxu1 %v1216_v0  ;;  %1195 = vmatprep.subr.bf16.mxu0 %v1194_v1  ;;  %v190_v28 = vld [vmem:[%s1429_s17 + $0x70] sm:$0xff]  ;;  %v191_v29 = vld [vmem:[%s1429_s17 + $0x78] sm:$0xff]  ;;  %v192_v30 = vld [vmem:[%s1429_s17 + $0x80] sm:$0xff] }
  0x1c   : > { %1219 = vmatprep.subr.bf16.mxu1 %v1218_v4  ;;  %v193_v31 = vld [vmem:[%s1429_s17 + $0x88] sm:$0xff]  ;;  %v194_v32 = vld [vmem:[%s1429_s17 + $0x90] sm:$0xff]  ;;  %v195_v33 = vld [vmem:[%s1429_s17 + $0x98] sm:$0xff] }
  0x1d   : > { %v196_v34 = vld [vmem:[%s1429_s17 + $0xa0] sm:$0xff]  ;;  %v197_v35 = vld [vmem:[%s1429_s17 + $0xa8] sm:$0xff]  ;;  %v198_v36 = vld [vmem:[%s1429_s17 + $0xb0] sm:$0xff] }
  0x1e   : > { %1197 = vmatpush1.bf16.msra.mxu0 %v1196_v8  ;;  %v199_v37 = vld [vmem:[%s1429_s17 + $0xb8] sm:$0xff]  ;;  %v200_v38 = vld [vmem:[%s1429_s17 + $0xc0] sm:$0xff]  ;;  %v201_v39 = vld [vmem:[%s1429_s17 + $0xc8] sm:$0xff] }
  0x1f   : > { %1221 = vmatpush1.bf16.msra.mxu1 %v1220_v9  ;;  %1103 = vmatprep.subr.msk.mxu0 %vm379_vm0, %v257_v10  ;;  %v202_v40 = vld [vmem:[%s1429_s17 + $0xd0] sm:$0xff]  ;;  %v203_v41 = vld [vmem:[%s1429_s17 + $0xd8] sm:$0xff]  ;;  %v204_v42 = vld [vmem:[%s1429_s17 + $0xe0] sm:$0xff] }
  0x20   : > { %1137 = vmatprep.subr.msk.mxu1 %vm379_vm0, %v259_v11  ;;  %v205_v43 = vld [vmem:[%s1429_s17 + $0xe8] sm:$0xff]  ;;  %v206_v44 = vld [vmem:[%s1429_s17 + $0xf0] sm:$0xff]  ;;  %v207_v45 = vld [vmem:[%s1429_s17 + $0xf8] sm:$0xff] }
  0x21   : > { %v260_v49 = vld [vmem:[%s1905_s2] sm:$0xf] }
  0x22   : > { %1104 = vmatpush1.msk.msra.mxu0 %vm379_vm0, %v256_v12  ;;  %v1599_v53 = vrot.slane %v260_v49, %v264_v48  ;;  %v1601_v54 = vrot.slane %v260_v49, %v272_v50  ;;  %v1605_v55 = vrot.slane %v260_v49, %v276_v52 }
  0x23   : > { %1138 = vmatpush1.msk.msra.mxu1 %vm379_vm0, %v258_v13  ;;  %1105 = vmatmul.mubr.msk.f32.vlgmr.msra.gmra.mrb[0].mxu0 %vm282_vm1, %v176_v14 }
  0x24   : > { %1139 = vmatmul.mubr.msk.f32.vlgmr.msra.gmra.mrb[0].mxu1 %vm282_vm1, %v176_v14  ;;  %462 = vmatprep.mubr.f32.mxu0 %v1239_v7 }
  0x25   : > { %719 = vmatprep.mubr.f32.mxu1 %v1239_v7 }
  0x27   : > { %1106 = vmatmul.mubr.msk.f32.gmra.mrb[2].mxu0 %vm282_vm1, %v177_v15 }
  0x28   : > { %1140 = vmatmul.mubr.msk.f32.gmra.mrb[2].mxu1 %vm282_vm1, %v177_v15  ;;  %468 = vmatprep.mubr.f32.mxu0 %v1239_v7 }
  0x29   : > { %725 = vmatprep.mubr.f32.mxu1 %v1239_v7 }
  0x2b   : > { %1107 = vmatmul.mubr.msk.f32.gmra.mrb[4].mxu0 %vm282_vm1, %v178_v16 }
  0x2c   : > { %1141 = vmatmul.mubr.msk.f32.gmra.mrb[4].mxu1 %vm282_vm1, %v178_v16  ;;  %474 = vmatprep.mubr.f32.mxu0 %v1239_v7 }
  0x2d   : > { %731 = vmatprep.mubr.f32.mxu1 %v1239_v7 }
  0x2f   : > { %1108 = vmatmul.mubr.msk.f32.gmra.mrb[6].mxu0 %vm282_vm1, %v179_v17 }
  0x30   : > { %1142 = vmatmul.mubr.msk.f32.gmra.mrb[6].mxu1 %vm282_vm1, %v179_v17  ;;  %480 = vmatprep.mubr.f32.mxu0 %v1239_v7 }
  0x31   : > { %737 = vmatprep.mubr.f32.mxu1 %v1239_v7 }
  0x33   : > { %1109 = vmatmul.mubr.msk.f32.gmra.mrb[8].mxu0 %vm282_vm1, %v180_v18 }
  0x34   : > { %1143 = vmatmul.mubr.msk.f32.gmra.mrb[8].mxu1 %vm282_vm1, %v180_v18  ;;  %486 = vmatprep.mubr.f32.mxu0 %v1239_v7 }
  0x35   : > { %743 = vmatprep.mubr.f32.mxu1 %v1239_v7 }
  0x37   : > { %1110 = vmatmul.mubr.msk.f32.gmra.mrb[10].mxu0 %vm282_vm1, %v181_v19 }
  0x38   : > { %1144 = vmatmul.mubr.msk.f32.gmra.mrb[10].mxu1 %vm282_vm1, %v181_v19  ;;  %492 = vmatprep.mubr.f32.mxu0 %v1239_v7 }
  0x39   : > { %749 = vmatprep.mubr.f32.mxu1 %v1239_v7 }
  0x3b   : > { %1111 = vmatmul.mubr.msk.f32.gmra.mrb[12].mxu0 %vm282_vm1, %v182_v20 }
  0x3c   : > { %1145 = vmatmul.mubr.msk.f32.gmra.mrb[12].mxu1 %vm282_vm1, %v182_v20  ;;  %498 = vmatprep.mubr.f32.mxu0 %v1239_v7 }
  0x3d   : > { %755 = vmatprep.mubr.f32.mxu1 %v1239_v7 }
  0x3f   : > { %1112 = vmatmul.mubr.msk.f32.gmra.mrb[14].mxu0 %vm282_vm1, %v183_v21 }
  0x40   : > { %1146 = vmatmul.mubr.msk.f32.gmra.mrb[14].mxu1 %vm282_vm1, %v183_v21  ;;  %504 = vmatprep.mubr.f32.mxu0 %v1239_v7 }
  0x41   : > { %761 = vmatprep.mubr.f32.mxu1 %v1239_v7 }
  0x43   : > { %1113 = vmatmul.mubr.msk.f32.gmra.mrb[16].mxu0 %vm282_vm1, %v184_v22 }
  0x44   : > { %1147 = vmatmul.mubr.msk.f32.gmra.mrb[16].mxu1 %vm282_vm1, %v184_v22  ;;  %510 = vmatprep.mubr.f32.mxu0 %v1239_v7 }
  0x45   : > { %767 = vmatprep.mubr.f32.mxu1 %v1239_v7 }
  0x47   : > { %1114 = vmatmul.mubr.msk.f32.gmra.mrb[18].mxu0 %vm282_vm1, %v185_v23 }
  0x48   : > { %1148 = vmatmul.mubr.msk.f32.gmra.mrb[18].mxu1 %vm282_vm1, %v185_v23  ;;  %516 = vmatprep.mubr.f32.mxu0 %v1239_v7 }
  0x49   : > { %773 = vmatprep.mubr.f32.mxu1 %v1239_v7 }
  0x4b   : > { %1115 = vmatmul.mubr.msk.f32.gmra.mrb[20].mxu0 %vm282_vm1, %v186_v24 }
  0x4c   : > { %1149 = vmatmul.mubr.msk.f32.gmra.mrb[20].mxu1 %vm282_vm1, %v186_v24  ;;  %522 = vmatprep.mubr.f32.mxu0 %v1239_v7 }
  0x4d   : > { %779 = vmatprep.mubr.f32.mxu1 %v1239_v7 }
  0x4f   : > { %1116 = vmatmul.mubr.msk.f32.gmra.mrb[22].mxu0 %vm282_vm1, %v187_v25 }
  0x50   : > { %1150 = vmatmul.mubr.msk.f32.gmra.mrb[22].mxu1 %vm282_vm1, %v187_v25  ;;  %528 = vmatprep.mubr.f32.mxu0 %v1239_v7 }
  0x51   : > { %785 = vmatprep.mubr.f32.mxu1 %v1239_v7 }
  0x53   : > { %1117 = vmatmul.mubr.msk.f32.gmra.mrb[24].mxu0 %vm282_vm1, %v188_v26 }
  0x54   : > { %1151 = vmatmul.mubr.msk.f32.gmra.mrb[24].mxu1 %vm282_vm1, %v188_v26  ;;  %534 = vmatprep.mubr.f32.mxu0 %v1239_v7 }
  0x55   : > { %791 = vmatprep.mubr.f32.mxu1 %v1239_v7 }
  0x57   : > { %1118 = vmatmul.mubr.msk.f32.gmra.mrb[26].mxu0 %vm282_vm1, %v189_v27 }
  0x58   : > { %1152 = vmatmul.mubr.msk.f32.gmra.mrb[26].mxu1 %vm282_vm1, %v189_v27  ;;  %540 = vmatprep.mubr.f32.mxu0 %v1239_v7 }
  0x59   : > { %797 = vmatprep.mubr.f32.mxu1 %v1239_v7 }
  0x5b   : > { %1119 = vmatmul.mubr.msk.f32.gmra.mrb[28].mxu0 %vm282_vm1, %v190_v28 }
  0x5c   : > { %1153 = vmatmul.mubr.msk.f32.gmra.mrb[28].mxu1 %vm282_vm1, %v190_v28  ;;  %546 = vmatprep.mubr.f32.mxu0 %v1239_v7 }
  0x5d   : > { %803 = vmatprep.mubr.f32.mxu1 %v1239_v7 }
  0x5f   : > { %1120 = vmatmul.mubr.msk.f32.gmra.mrb[30].mxu0 %vm282_vm1, %v191_v29 }
  0x60   : > { %1154 = vmatmul.mubr.msk.f32.gmra.mrb[30].mxu1 %vm282_vm1, %v191_v29  ;;  %552 = vmatprep.mubr.f32.mxu0 %v1239_v7 }
  0x61   : > { %809 = vmatprep.mubr.f32.mxu1 %v1239_v7 }
  0x63   : > { %1121 = vmatmul.mubr.msk.f32.gmra.mrb[32].mxu0 %vm282_vm1, %v192_v30 }
  0x64   : > { %1155 = vmatmul.mubr.msk.f32.gmra.mrb[32].mxu1 %vm282_vm1, %v192_v30  ;;  %558 = vmatprep.mubr.f32.mxu0 %v1239_v7 }
  0x65   : > { %815 = vmatprep.mubr.f32.mxu1 %v1239_v7 }
  0x67   : > { %1122 = vmatmul.mubr.msk.f32.gmra.mrb[34].mxu0 %vm282_vm1, %v193_v31 }
  0x68   : > { %1156 = vmatmul.mubr.msk.f32.gmra.mrb[34].mxu1 %vm282_vm1, %v193_v31  ;;  %564 = vmatprep.mubr.f32.mxu0 %v1239_v7 }
  0x69   : > { %821 = vmatprep.mubr.f32.mxu1 %v1239_v7 }
  0x6b   : > { %1123 = vmatmul.mubr.msk.f32.gmra.mrb[36].mxu0 %vm282_vm1, %v194_v32 }
  0x6c   : > { %1157 = vmatmul.mubr.msk.f32.gmra.mrb[36].mxu1 %vm282_vm1, %v194_v32  ;;  %570 = vmatprep.mubr.f32.mxu0 %v1239_v7 }
  0x6d   : > { %827 = vmatprep.mubr.f32.mxu1 %v1239_v7 }
  0x6f   : > { %1124 = vmatmul.mubr.msk.f32.gmra.mrb[38].mxu0 %vm282_vm1, %v195_v33 }
  0x70   : > { %1158 = vmatmul.mubr.msk.f32.gmra.mrb[38].mxu1 %vm282_vm1, %v195_v33  ;;  %576 = vmatprep.mubr.f32.mxu0 %v1239_v7 }
  0x71   : > { %833 = vmatprep.mubr.f32.mxu1 %v1239_v7 }
  0x73   : > { %1125 = vmatmul.mubr.msk.f32.gmra.mrb[40].mxu0 %vm282_vm1, %v196_v34 }
  0x74   : > { %1159 = vmatmul.mubr.msk.f32.gmra.mrb[40].mxu1 %vm282_vm1, %v196_v34  ;;  %582 = vmatprep.mubr.f32.mxu0 %v1239_v7 }
  0x75   : > { %839 = vmatprep.mubr.f32.mxu1 %v1239_v7 }
  0x77   : > { %1126 = vmatmul.mubr.msk.f32.gmra.mrb[42].mxu0 %vm282_vm1, %v197_v35 }
  0x78   : > { %1160 = vmatmul.mubr.msk.f32.gmra.mrb[42].mxu1 %vm282_vm1, %v197_v35  ;;  %588 = vmatprep.mubr.f32.mxu0 %v1239_v7 }
  0x79   : > { %845 = vmatprep.mubr.f32.mxu1 %v1239_v7 }
  0x7b   : > { %1127 = vmatmul.mubr.msk.f32.gmra.mrb[44].mxu0 %vm282_vm1, %v198_v36 }
  0x7c   : > { %1161 = vmatmul.mubr.msk.f32.gmra.mrb[44].mxu1 %vm282_vm1, %v198_v36  ;;  %594 = vmatprep.mubr.f32.mxu0 %v1239_v7 }
  0x7d   : > { %851 = vmatprep.mubr.f32.mxu1 %v1239_v7 }
  0x7f   : > { %1128 = vmatmul.mubr.msk.f32.gmra.mrb[46].mxu0 %vm282_vm1, %v199_v37 }
  0x80   : > { %1162 = vmatmul.mubr.msk.f32.gmra.mrb[46].mxu1 %vm282_vm1, %v199_v37  ;;  %600 = vmatprep.mubr.f32.mxu0 %v1239_v7 }
  0x81   : > { %857 = vmatprep.mubr.f32.mxu1 %v1239_v7 }
  0x83   : > { %1129 = vmatmul.mubr.msk.f32.gmra.mrb[48].mxu0 %vm282_vm1, %v200_v38 }
  0x84   : > { %1163 = vmatmul.mubr.msk.f32.gmra.mrb[48].mxu1 %vm282_vm1, %v200_v38  ;;  %606 = vmatprep.mubr.f32.mxu0 %v1239_v7 }
  0x85   : > { %863 = vmatprep.mubr.f32.mxu1 %v1239_v7 }
  0x87   : > { %1130 = vmatmul.mubr.msk.f32.gmra.mrb[50].mxu0 %vm282_vm1, %v201_v39 }
  0x88   : > { %1164 = vmatmul.mubr.msk.f32.gmra.mrb[50].mxu1 %vm282_vm1, %v201_v39  ;;  %612 = vmatprep.mubr.f32.mxu0 %v1239_v7 }
  0x89   : > { %869 = vmatprep.mubr.f32.mxu1 %v1239_v7 }
  0x8b   : > { %1131 = vmatmul.mubr.msk.f32.gmra.mrb[52].mxu0 %vm282_vm1, %v202_v40 }
  0x8c   : > { %1165 = vmatmul.mubr.msk.f32.gmra.mrb[52].mxu1 %vm282_vm1, %v202_v40  ;;  %618 = vmatprep.mubr.f32.mxu0 %v1239_v7 }
  0x8d   : > { %875 = vmatprep.mubr.f32.mxu1 %v1239_v7 }
  0x8f   : > { %1132 = vmatmul.mubr.msk.f32.gmra.mrb[54].mxu0 %vm282_vm1, %v203_v41 }
  0x90   : > { %1166 = vmatmul.mubr.msk.f32.gmra.mrb[54].mxu1 %vm282_vm1, %v203_v41  ;;  %624 = vmatprep.mubr.f32.mxu0 %v1239_v7 }
  0x91   : > { %881 = vmatprep.mubr.f32.mxu1 %v1239_v7 }
  0x93   : > { %1133 = vmatmul.mubr.msk.f32.gmra.mrb[56].mxu0 %vm282_vm1, %v204_v42 }
  0x94   : > { %1167 = vmatmul.mubr.msk.f32.gmra.mrb[56].mxu1 %vm282_vm1, %v204_v42  ;;  %630 = vmatprep.mubr.f32.mxu0 %v1239_v7 }
  0x95   : > { %887 = vmatprep.mubr.f32.mxu1 %v1239_v7 }
  0x97   : > { %1134 = vmatmul.mubr.msk.f32.gmra.mrb[58].mxu0 %vm282_vm1, %v205_v43 }
  0x98   : > { %1168 = vmatmul.mubr.msk.f32.gmra.mrb[58].mxu1 %vm282_vm1, %v205_v43  ;;  %636 = vmatprep.mubr.f32.mxu0 %v1239_v7 }
  0x99   : > { %893 = vmatprep.mubr.f32.mxu1 %v1239_v7 }
  0x9b   : > { %1135 = vmatmul.mubr.msk.f32.gmra.mrb[60].mxu0 %vm282_vm1, %v206_v44 }
  0x9c   : > { %1169 = vmatmul.mubr.msk.f32.gmra.mrb[60].mxu1 %vm282_vm1, %v206_v44  ;;  %642 = vmatprep.mubr.f32.mxu0 %v1239_v7 }
  0x9d   : > { %899 = vmatprep.mubr.f32.mxu1 %v1239_v7  ;;  %v1603_v7 = vrot.slane %v260_v49, %v268_v51 }
  0x9f   : > { %1136 = vmatmul.mubr.msk.f32.gmra.mrb[62].mxu0 %vm282_vm1, %v207_v45 }
  0xa0   : > { %1170 = vmatmul.mubr.msk.f32.gmra.mrb[62].mxu1 %vm282_vm1, %v207_v45 }
  0xf6   : > { %v458_v56 = vpop.f32.mrb[0].mxu0 }
  0xf7   : > { %v459_v57 = vadd.f32 %v458_v56, %v1599_v53  ;;  %v715_v58 = vpop.f32.mrb[0].mxu1  ;;  %v460_v59 = vpop.f32.mrb[1].mxu0 }
  0xf8   : > { %v716_v60 = vadd.f32 %v715_v58, %v1601_v54  ;;  %v461_v61 = vadd.f32 %v460_v59, %v1603_v7  ;;  %v717_v62 = vpop.f32.mrb[1].mxu1 }
  0xf9   : > { %906 = vst [vmem:[%s1610_s28] sm:$0xff] %v459_v57  ;;  %v718_v63 = vadd.f32 %v717_v62, %v1605_v55 }
  0xfa   : > { %908 = vst [vmem:[%s1610_s28 + $0x10] sm:$0xff] %v716_v60  ;;  %907 = vst [vmem:[%s1610_s28 + $0x8] sm:$0xff] %v461_v61  ;;  %v464_v0 = vpop.f32.mrb[2].mxu0 }
  0xfb   : > { %910 = vst.msk [vmem:[%s1610_s28 + $0x18] sm:$0xff] %vm909_vm2, %v718_v63  ;;  %v465_v1 = vadd.f32 %v464_v0, %v1599_v53  ;;  %v721_v2 = vpop.f32.mrb[2].mxu1  ;;  %v466_v3 = vpop.f32.mrb[3].mxu0 }
  0xfc   : > { %v722_v4 = vadd.f32 %v721_v2, %v1601_v54  ;;  %v467_v5 = vadd.f32 %v466_v3, %v1603_v7  ;;  %v723_v6 = vpop.f32.mrb[3].mxu1 }
  0xfd   : > { %911 = vst [vmem:[%s1610_s28 + $0x20] sm:$0xff] %v465_v1  ;;  %v724_v8 = vadd.f32 %v723_v6, %v1605_v55 }
  0xfe   : > { %913 = vst [vmem:[%s1610_s28 + $0x30] sm:$0xff] %v722_v4  ;;  %912 = vst [vmem:[%s1610_s28 + $0x28] sm:$0xff] %v467_v5  ;;  %v470_v9 = vpop.f32.mrb[4].mxu0 }
  0xff   : > { %914 = vst.msk [vmem:[%s1610_s28 + $0x38] sm:$0xff] %vm909_vm2, %v724_v8  ;;  %v471_v10 = vadd.f32 %v470_v9, %v1599_v53  ;;  %v727_v11 = vpop.f32.mrb[4].mxu1  ;;  %v472_v12 = vpop.f32.mrb[5].mxu0 }
 0x100   : > { %v728_v13 = vadd.f32 %v727_v11, %v1601_v54  ;;  %v473_v14 = vadd.f32 %v472_v12, %v1603_v7  ;;  %v729_v15 = vpop.f32.mrb[5].mxu1 }
 0x101   : > { %915 = vst [vmem:[%s1610_s28 + $0x40] sm:$0xff] %v471_v10  ;;  %v730_v16 = vadd.f32 %v729_v15, %v1605_v55 }
 0x102   : > { %917 = vst [vmem:[%s1610_s28 + $0x50] sm:$0xff] %v728_v13  ;;  %916 = vst [vmem:[%s1610_s28 + $0x48] sm:$0xff] %v473_v14  ;;  %v476_v17 = vpop.f32.mrb[6].mxu0 }
 0x103   : > { %918 = vst.msk [vmem:[%s1610_s28 + $0x58] sm:$0xff] %vm909_vm2, %v730_v16  ;;  %v477_v18 = vadd.f32 %v476_v17, %v1599_v53  ;;  %v733_v19 = vpop.f32.mrb[6].mxu1  ;;  %v478_v20 = vpop.f32.mrb[7].mxu0 }
 0x104   : > { %v734_v21 = vadd.f32 %v733_v19, %v1601_v54  ;;  %v479_v22 = vadd.f32 %v478_v20, %v1603_v7  ;;  %v735_v23 = vpop.f32.mrb[7].mxu1 }
 0x105   : > { %919 = vst [vmem:[%s1610_s28 + $0x60] sm:$0xff] %v477_v18  ;;  %v736_v24 = vadd.f32 %v735_v23, %v1605_v55 }
 0x106   : > { %921 = vst [vmem:[%s1610_s28 + $0x70] sm:$0xff] %v734_v21  ;;  %920 = vst [vmem:[%s1610_s28 + $0x68] sm:$0xff] %v479_v22  ;;  %v482_v25 = vpop.f32.mrb[8].mxu0 }
 0x107   : > { %922 = vst.msk [vmem:[%s1610_s28 + $0x78] sm:$0xff] %vm909_vm2, %v736_v24  ;;  %v483_v26 = vadd.f32 %v482_v25, %v1599_v53  ;;  %v739_v27 = vpop.f32.mrb[8].mxu1  ;;  %v484_v28 = vpop.f32.mrb[9].mxu0 }
 0x108   : > { %v740_v29 = vadd.f32 %v739_v27, %v1601_v54  ;;  %v485_v30 = vadd.f32 %v484_v28, %v1603_v7  ;;  %v741_v31 = vpop.f32.mrb[9].mxu1 }
 0x109   : > { %923 = vst [vmem:[%s1610_s28 + $0x80] sm:$0xff] %v483_v26  ;;  %v742_v32 = vadd.f32 %v741_v31, %v1605_v55 }
 0x10a   : > { %925 = vst [vmem:[%s1610_s28 + $0x90] sm:$0xff] %v740_v29  ;;  %924 = vst [vmem:[%s1610_s28 + $0x88] sm:$0xff] %v485_v30  ;;  %v488_v33 = vpop.f32.mrb[10].mxu0 }
 0x10b   : > { %926 = vst.msk [vmem:[%s1610_s28 + $0x98] sm:$0xff] %vm909_vm2, %v742_v32  ;;  %v489_v34 = vadd.f32 %v488_v33, %v1599_v53  ;;  %v745_v35 = vpop.f32.mrb[10].mxu1  ;;  %v490_v36 = vpop.f32.mrb[11].mxu0 }
 0x10c   : > { %v746_v37 = vadd.f32 %v745_v35, %v1601_v54  ;;  %v491_v38 = vadd.f32 %v490_v36, %v1603_v7  ;;  %v747_v39 = vpop.f32.mrb[11].mxu1 }
 0x10d   : > { %927 = vst [vmem:[%s1610_s28 + $0xa0] sm:$0xff] %v489_v34  ;;  %v748_v40 = vadd.f32 %v747_v39, %v1605_v55 }
 0x10e   : > { %929 = vst [vmem:[%s1610_s28 + $0xb0] sm:$0xff] %v746_v37  ;;  %928 = vst [vmem:[%s1610_s28 + $0xa8] sm:$0xff] %v491_v38  ;;  %v494_v41 = vpop.f32.mrb[12].mxu0 }
 0x10f   : > { %930 = vst.msk [vmem:[%s1610_s28 + $0xb8] sm:$0xff] %vm909_vm2, %v748_v40  ;;  %v495_v42 = vadd.f32 %v494_v41, %v1599_v53  ;;  %v751_v43 = vpop.f32.mrb[12].mxu1  ;;  %v496_v44 = vpop.f32.mrb[13].mxu0 }
 0x110   : > { %v752_v45 = vadd.f32 %v751_v43, %v1601_v54  ;;  %v497_v46 = vadd.f32 %v496_v44, %v1603_v7  ;;  %v753_v47 = vpop.f32.mrb[13].mxu1 }
 0x111   : > { %931 = vst [vmem:[%s1610_s28 + $0xc0] sm:$0xff] %v495_v42  ;;  %v754_v48 = vadd.f32 %v753_v47, %v1605_v55 }
 0x112   : > { %933 = vst [vmem:[%s1610_s28 + $0xd0] sm:$0xff] %v752_v45  ;;  %932 = vst [vmem:[%s1610_s28 + $0xc8] sm:$0xff] %v497_v46  ;;  %v500_v49 = vpop.f32.mrb[14].mxu0 }
 0x113   : > { %934 = vst.msk [vmem:[%s1610_s28 + $0xd8] sm:$0xff] %vm909_vm2, %v754_v48  ;;  %v501_v50 = vadd.f32 %v500_v49, %v1599_v53  ;;  %v757_v51 = vpop.f32.mrb[14].mxu1  ;;  %v502_v52 = vpop.f32.mrb[15].mxu0 }
 0x114   : > { %v758_v56 = vadd.f32 %v757_v51, %v1601_v54  ;;  %v503_v57 = vadd.f32 %v502_v52, %v1603_v7  ;;  %v759_v58 = vpop.f32.mrb[15].mxu1 }
 0x115   : > { %935 = vst [vmem:[%s1610_s28 + $0xe0] sm:$0xff] %v501_v50  ;;  %v760_v59 = vadd.f32 %v759_v58, %v1605_v55 }
 0x116   : > { %937 = vst [vmem:[%s1610_s28 + $0xf0] sm:$0xff] %v758_v56  ;;  %936 = vst [vmem:[%s1610_s28 + $0xe8] sm:$0xff] %v503_v57  ;;  %v506_v60 = vpop.f32.mrb[16].mxu0 }
 0x117   : > { %938 = vst.msk [vmem:[%s1610_s28 + $0xf8] sm:$0xff] %vm909_vm2, %v760_v59  ;;  %v507_v61 = vadd.f32 %v506_v60, %v1599_v53  ;;  %v763_v62 = vpop.f32.mrb[16].mxu1  ;;  %v508_v63 = vpop.f32.mrb[17].mxu0 }
 0x118   : > { %v764_v0 = vadd.f32 %v763_v62, %v1601_v54  ;;  %v509_v1 = vadd.f32 %v508_v63, %v1603_v7  ;;  %v765_v2 = vpop.f32.mrb[17].mxu1 }
 0x119   : > { %939 = vst [vmem:[%s1610_s28 + $0x100] sm:$0xff] %v507_v61  ;;  %v766_v3 = vadd.f32 %v765_v2, %v1605_v55 }
 0x11a   : > { %941 = vst [vmem:[%s1610_s28 + $0x110] sm:$0xff] %v764_v0  ;;  %940 = vst [vmem:[%s1610_s28 + $0x108] sm:$0xff] %v509_v1  ;;  %v512_v4 = vpop.f32.mrb[18].mxu0 }
 0x11b   : > { %942 = vst.msk [vmem:[%s1610_s28 + $0x118] sm:$0xff] %vm909_vm2, %v766_v3  ;;  %v513_v5 = vadd.f32 %v512_v4, %v1599_v53  ;;  %v769_v6 = vpop.f32.mrb[18].mxu1  ;;  %v514_v8 = vpop.f32.mrb[19].mxu0 }
 0x11c   : > { %v770_v9 = vadd.f32 %v769_v6, %v1601_v54  ;;  %v515_v10 = vadd.f32 %v514_v8, %v1603_v7  ;;  %v771_v11 = vpop.f32.mrb[19].mxu1 }
 0x11d   : > { %943 = vst [vmem:[%s1610_s28 + $0x120] sm:$0xff] %v513_v5  ;;  %v772_v12 = vadd.f32 %v771_v11, %v1605_v55 }
 0x11e   : > { %945 = vst [vmem:[%s1610_s28 + $0x130] sm:$0xff] %v770_v9  ;;  %944 = vst [vmem:[%s1610_s28 + $0x128] sm:$0xff] %v515_v10  ;;  %v518_v13 = vpop.f32.mrb[20].mxu0 }
 0x11f   : > { %946 = vst.msk [vmem:[%s1610_s28 + $0x138] sm:$0xff] %vm909_vm2, %v772_v12  ;;  %v519_v14 = vadd.f32 %v518_v13, %v1599_v53  ;;  %v775_v15 = vpop.f32.mrb[20].mxu1  ;;  %v520_v16 = vpop.f32.mrb[21].mxu0 }
 0x120   : > { %v776_v17 = vadd.f32 %v775_v15, %v1601_v54  ;;  %v521_v18 = vadd.f32 %v520_v16, %v1603_v7  ;;  %v777_v19 = vpop.f32.mrb[21].mxu1 }
 0x121   : > { %947 = vst [vmem:[%s1610_s28 + $0x140] sm:$0xff] %v519_v14  ;;  %v778_v20 = vadd.f32 %v777_v19, %v1605_v55 }
 0x122   : > { %949 = vst [vmem:[%s1610_s28 + $0x150] sm:$0xff] %v776_v17  ;;  %948 = vst [vmem:[%s1610_s28 + $0x148] sm:$0xff] %v521_v18  ;;  %v524_v21 = vpop.f32.mrb[22].mxu0 }
 0x123   : > { %950 = vst.msk [vmem:[%s1610_s28 + $0x158] sm:$0xff] %vm909_vm2, %v778_v20  ;;  %v525_v22 = vadd.f32 %v524_v21, %v1599_v53  ;;  %v781_v23 = vpop.f32.mrb[22].mxu1  ;;  %v526_v24 = vpop.f32.mrb[23].mxu0 }
 0x124   : > { %v782_v25 = vadd.f32 %v781_v23, %v1601_v54  ;;  %v527_v26 = vadd.f32 %v526_v24, %v1603_v7  ;;  %v783_v27 = vpop.f32.mrb[23].mxu1 }
 0x125   : > { %951 = vst [vmem:[%s1610_s28 + $0x160] sm:$0xff] %v525_v22  ;;  %v784_v28 = vadd.f32 %v783_v27, %v1605_v55 }
 0x126   : > { %953 = vst [vmem:[%s1610_s28 + $0x170] sm:$0xff] %v782_v25  ;;  %952 = vst [vmem:[%s1610_s28 + $0x168] sm:$0xff] %v527_v26  ;;  %v530_v29 = vpop.f32.mrb[24].mxu0 }
 0x127   : > { %954 = vst.msk [vmem:[%s1610_s28 + $0x178] sm:$0xff] %vm909_vm2, %v784_v28  ;;  %v531_v30 = vadd.f32 %v530_v29, %v1599_v53  ;;  %v787_v31 = vpop.f32.mrb[24].mxu1  ;;  %v532_v32 = vpop.f32.mrb[25].mxu0 }
 0x128   : > { %v788_v33 = vadd.f32 %v787_v31, %v1601_v54  ;;  %v533_v34 = vadd.f32 %v532_v32, %v1603_v7  ;;  %v789_v35 = vpop.f32.mrb[25].mxu1 }
 0x129   : > { %955 = vst [vmem:[%s1610_s28 + $0x180] sm:$0xff] %v531_v30  ;;  %v790_v36 = vadd.f32 %v789_v35, %v1605_v55 }
 0x12a   : > { %957 = vst [vmem:[%s1610_s28 + $0x190] sm:$0xff] %v788_v33  ;;  %956 = vst [vmem:[%s1610_s28 + $0x188] sm:$0xff] %v533_v34  ;;  %v536_v37 = vpop.f32.mrb[26].mxu0 }
 0x12b   : > { %958 = vst.msk [vmem:[%s1610_s28 + $0x198] sm:$0xff] %vm909_vm2, %v790_v36  ;;  %v537_v38 = vadd.f32 %v536_v37, %v1599_v53  ;;  %v793_v39 = vpop.f32.mrb[26].mxu1  ;;  %v538_v40 = vpop.f32.mrb[27].mxu0 }
 0x12c   : > { %v794_v41 = vadd.f32 %v793_v39, %v1601_v54  ;;  %v539_v42 = vadd.f32 %v538_v40, %v1603_v7  ;;  %v795_v43 = vpop.f32.mrb[27].mxu1 }
 0x12d   : > { %959 = vst [vmem:[%s1610_s28 + $0x1a0] sm:$0xff] %v537_v38  ;;  %v796_v44 = vadd.f32 %v795_v43, %v1605_v55 }
 0x12e   : > { %961 = vst [vmem:[%s1610_s28 + $0x1b0] sm:$0xff] %v794_v41  ;;  %960 = vst [vmem:[%s1610_s28 + $0x1a8] sm:$0xff] %v539_v42  ;;  %v542_v45 = vpop.f32.mrb[28].mxu0 }
 0x12f   : > { %962 = vst.msk [vmem:[%s1610_s28 + $0x1b8] sm:$0xff] %vm909_vm2, %v796_v44  ;;  %v543_v46 = vadd.f32 %v542_v45, %v1599_v53  ;;  %v799_v47 = vpop.f32.mrb[28].mxu1  ;;  %v544_v48 = vpop.f32.mrb[29].mxu0 }
 0x130   : > { %v800_v49 = vadd.f32 %v799_v47, %v1601_v54  ;;  %v545_v50 = vadd.f32 %v544_v48, %v1603_v7  ;;  %v801_v51 = vpop.f32.mrb[29].mxu1 }
 0x131   : > { %963 = vst [vmem:[%s1610_s28 + $0x1c0] sm:$0xff] %v543_v46  ;;  %v802_v52 = vadd.f32 %v801_v51, %v1605_v55 }
 0x132   : > { %965 = vst [vmem:[%s1610_s28 + $0x1d0] sm:$0xff] %v800_v49  ;;  %964 = vst [vmem:[%s1610_s28 + $0x1c8] sm:$0xff] %v545_v50  ;;  %v548_v56 = vpop.f32.mrb[30].mxu0 }
 0x133   : > { %966 = vst.msk [vmem:[%s1610_s28 + $0x1d8] sm:$0xff] %vm909_vm2, %v802_v52  ;;  %v549_v57 = vadd.f32 %v548_v56, %v1599_v53  ;;  %v805_v58 = vpop.f32.mrb[30].mxu1  ;;  %v550_v59 = vpop.f32.mrb[31].mxu0 }
 0x134   : > { %v806_v60 = vadd.f32 %v805_v58, %v1601_v54  ;;  %v551_v61 = vadd.f32 %v550_v59, %v1603_v7  ;;  %v807_v62 = vpop.f32.mrb[31].mxu1 }
 0x135   : > { %967 = vst [vmem:[%s1610_s28 + $0x1e0] sm:$0xff] %v549_v57  ;;  %v808_v63 = vadd.f32 %v807_v62, %v1605_v55 }
 0x136   : > { %969 = vst [vmem:[%s1610_s28 + $0x1f0] sm:$0xff] %v806_v60  ;;  %968 = vst [vmem:[%s1610_s28 + $0x1e8] sm:$0xff] %v551_v61  ;;  %v554_v0 = vpop.f32.mrb[32].mxu0 }
 0x137   : > { %970 = vst.msk [vmem:[%s1610_s28 + $0x1f8] sm:$0xff] %vm909_vm2, %v808_v63  ;;  %v555_v1 = vadd.f32 %v554_v0, %v1599_v53  ;;  %v811_v2 = vpop.f32.mrb[32].mxu1  ;;  %v556_v3 = vpop.f32.mrb[33].mxu0 }
 0x138   : > { %v812_v4 = vadd.f32 %v811_v2, %v1601_v54  ;;  %v557_v5 = vadd.f32 %v556_v3, %v1603_v7  ;;  %v813_v6 = vpop.f32.mrb[33].mxu1 }
 0x139   : > { %971 = vst [vmem:[%s1610_s28 + $0x200] sm:$0xff] %v555_v1  ;;  %v814_v8 = vadd.f32 %v813_v6, %v1605_v55 }
 0x13a   : > { %973 = vst [vmem:[%s1610_s28 + $0x210] sm:$0xff] %v812_v4  ;;  %972 = vst [vmem:[%s1610_s28 + $0x208] sm:$0xff] %v557_v5  ;;  %v560_v9 = vpop.f32.mrb[34].mxu0 }
 0x13b   : > { %974 = vst.msk [vmem:[%s1610_s28 + $0x218] sm:$0xff] %vm909_vm2, %v814_v8  ;;  %v561_v10 = vadd.f32 %v560_v9, %v1599_v53  ;;  %v817_v11 = vpop.f32.mrb[34].mxu1  ;;  %v562_v12 = vpop.f32.mrb[35].mxu0 }
 0x13c   : > { %v818_v13 = vadd.f32 %v817_v11, %v1601_v54  ;;  %v563_v14 = vadd.f32 %v562_v12, %v1603_v7  ;;  %v819_v15 = vpop.f32.mrb[35].mxu1 }
 0x13d   : > { %975 = vst [vmem:[%s1610_s28 + $0x220] sm:$0xff] %v561_v10  ;;  %v820_v16 = vadd.f32 %v819_v15, %v1605_v55 }
 0x13e   : > { %977 = vst [vmem:[%s1610_s28 + $0x230] sm:$0xff] %v818_v13  ;;  %976 = vst [vmem:[%s1610_s28 + $0x228] sm:$0xff] %v563_v14  ;;  %v566_v17 = vpop.f32.mrb[36].mxu0 }
 0x13f   : > { %978 = vst.msk [vmem:[%s1610_s28 + $0x238] sm:$0xff] %vm909_vm2, %v820_v16  ;;  %v567_v18 = vadd.f32 %v566_v17, %v1599_v53  ;;  %v823_v19 = vpop.f32.mrb[36].mxu1  ;;  %v568_v20 = vpop.f32.mrb[37].mxu0 }
 0x140   : > { %v824_v21 = vadd.f32 %v823_v19, %v1601_v54  ;;  %v569_v22 = vadd.f32 %v568_v20, %v1603_v7  ;;  %v825_v23 = vpop.f32.mrb[37].mxu1 }
 0x141   : > { %979 = vst [vmem:[%s1610_s28 + $0x240] sm:$0xff] %v567_v18  ;;  %v826_v24 = vadd.f32 %v825_v23, %v1605_v55 }
 0x142   : > { %981 = vst [vmem:[%s1610_s28 + $0x250] sm:$0xff] %v824_v21  ;;  %980 = vst [vmem:[%s1610_s28 + $0x248] sm:$0xff] %v569_v22  ;;  %v572_v25 = vpop.f32.mrb[38].mxu0 }
 0x143   : > { %982 = vst.msk [vmem:[%s1610_s28 + $0x258] sm:$0xff] %vm909_vm2, %v826_v24  ;;  %v573_v26 = vadd.f32 %v572_v25, %v1599_v53  ;;  %v829_v27 = vpop.f32.mrb[38].mxu1  ;;  %v574_v28 = vpop.f32.mrb[39].mxu0 }
 0x144   : > { %v830_v29 = vadd.f32 %v829_v27, %v1601_v54  ;;  %v575_v30 = vadd.f32 %v574_v28, %v1603_v7  ;;  %v831_v31 = vpop.f32.mrb[39].mxu1 }
 0x145   : > { %983 = vst [vmem:[%s1610_s28 + $0x260] sm:$0xff] %v573_v26  ;;  %v832_v32 = vadd.f32 %v831_v31, %v1605_v55 }
 0x146   : > { %985 = vst [vmem:[%s1610_s28 + $0x270] sm:$0xff] %v830_v29  ;;  %984 = vst [vmem:[%s1610_s28 + $0x268] sm:$0xff] %v575_v30  ;;  %v578_v33 = vpop.f32.mrb[40].mxu0 }
 0x147   : > { %986 = vst.msk [vmem:[%s1610_s28 + $0x278] sm:$0xff] %vm909_vm2, %v832_v32  ;;  %v579_v34 = vadd.f32 %v578_v33, %v1599_v53  ;;  %v835_v35 = vpop.f32.mrb[40].mxu1  ;;  %v580_v36 = vpop.f32.mrb[41].mxu0 }
 0x148   : > { %v836_v37 = vadd.f32 %v835_v35, %v1601_v54  ;;  %v581_v38 = vadd.f32 %v580_v36, %v1603_v7  ;;  %v837_v39 = vpop.f32.mrb[41].mxu1 }
 0x149   : > { %987 = vst [vmem:[%s1610_s28 + $0x280] sm:$0xff] %v579_v34  ;;  %v838_v40 = vadd.f32 %v837_v39, %v1605_v55 }
 0x14a   : > { %989 = vst [vmem:[%s1610_s28 + $0x290] sm:$0xff] %v836_v37  ;;  %988 = vst [vmem:[%s1610_s28 + $0x288] sm:$0xff] %v581_v38  ;;  %v584_v41 = vpop.f32.mrb[42].mxu0 }
 0x14b   : > { %990 = vst.msk [vmem:[%s1610_s28 + $0x298] sm:$0xff] %vm909_vm2, %v838_v40  ;;  %v585_v42 = vadd.f32 %v584_v41, %v1599_v53  ;;  %v841_v43 = vpop.f32.mrb[42].mxu1  ;;  %v586_v44 = vpop.f32.mrb[43].mxu0 }
 0x14c   : > { %v842_v45 = vadd.f32 %v841_v43, %v1601_v54  ;;  %v587_v46 = vadd.f32 %v586_v44, %v1603_v7  ;;  %v843_v47 = vpop.f32.mrb[43].mxu1 }
 0x14d   : > { %991 = vst [vmem:[%s1610_s28 + $0x2a0] sm:$0xff] %v585_v42  ;;  %v844_v48 = vadd.f32 %v843_v47, %v1605_v55 }
 0x14e   : > { %993 = vst [vmem:[%s1610_s28 + $0x2b0] sm:$0xff] %v842_v45  ;;  %992 = vst [vmem:[%s1610_s28 + $0x2a8] sm:$0xff] %v587_v46  ;;  %v590_v49 = vpop.f32.mrb[44].mxu0 }
 0x14f   : > { %994 = vst.msk [vmem:[%s1610_s28 + $0x2b8] sm:$0xff] %vm909_vm2, %v844_v48  ;;  %v591_v50 = vadd.f32 %v590_v49, %v1599_v53  ;;  %v847_v51 = vpop.f32.mrb[44].mxu1  ;;  %v592_v52 = vpop.f32.mrb[45].mxu0 }
 0x150   : > { %v848_v56 = vadd.f32 %v847_v51, %v1601_v54  ;;  %v593_v57 = vadd.f32 %v592_v52, %v1603_v7  ;;  %v849_v58 = vpop.f32.mrb[45].mxu1 }
 0x151   : > { %995 = vst [vmem:[%s1610_s28 + $0x2c0] sm:$0xff] %v591_v50  ;;  %v850_v59 = vadd.f32 %v849_v58, %v1605_v55 }
 0x152   : > { %997 = vst [vmem:[%s1610_s28 + $0x2d0] sm:$0xff] %v848_v56  ;;  %996 = vst [vmem:[%s1610_s28 + $0x2c8] sm:$0xff] %v593_v57  ;;  %v596_v60 = vpop.f32.mrb[46].mxu0 }
 0x153   : > { %998 = vst.msk [vmem:[%s1610_s28 + $0x2d8] sm:$0xff] %vm909_vm2, %v850_v59  ;;  %v597_v61 = vadd.f32 %v596_v60, %v1599_v53  ;;  %v853_v62 = vpop.f32.mrb[46].mxu1  ;;  %v598_v63 = vpop.f32.mrb[47].mxu0 }
 0x154   : > { %v854_v0 = vadd.f32 %v853_v62, %v1601_v54  ;;  %v599_v1 = vadd.f32 %v598_v63, %v1603_v7  ;;  %v855_v2 = vpop.f32.mrb[47].mxu1 }
 0x155   : > { %999 = vst [vmem:[%s1610_s28 + $0x2e0] sm:$0xff] %v597_v61  ;;  %v856_v3 = vadd.f32 %v855_v2, %v1605_v55 }
 0x156   : > { %1001 = vst [vmem:[%s1610_s28 + $0x2f0] sm:$0xff] %v854_v0  ;;  %1000 = vst [vmem:[%s1610_s28 + $0x2e8] sm:$0xff] %v599_v1  ;;  %v602_v4 = vpop.f32.mrb[48].mxu0 }
 0x157   : > { %1002 = vst.msk [vmem:[%s1610_s28 + $0x2f8] sm:$0xff] %vm909_vm2, %v856_v3  ;;  %v603_v5 = vadd.f32 %v602_v4, %v1599_v53  ;;  %v859_v6 = vpop.f32.mrb[48].mxu1  ;;  %v604_v8 = vpop.f32.mrb[49].mxu0 }
 0x158   : > { %v860_v9 = vadd.f32 %v859_v6, %v1601_v54  ;;  %v605_v10 = vadd.f32 %v604_v8, %v1603_v7  ;;  %v861_v11 = vpop.f32.mrb[49].mxu1 }
 0x159   : > { %1003 = vst [vmem:[%s1610_s28 + $0x300] sm:$0xff] %v603_v5  ;;  %v862_v12 = vadd.f32 %v861_v11, %v1605_v55 }
 0x15a   : > { %1005 = vst [vmem:[%s1610_s28 + $0x310] sm:$0xff] %v860_v9  ;;  %1004 = vst [vmem:[%s1610_s28 + $0x308] sm:$0xff] %v605_v10  ;;  %v608_v13 = vpop.f32.mrb[50].mxu0 }
 0x15b   : > { %1006 = vst.msk [vmem:[%s1610_s28 + $0x318] sm:$0xff] %vm909_vm2, %v862_v12  ;;  %v609_v14 = vadd.f32 %v608_v13, %v1599_v53  ;;  %v865_v15 = vpop.f32.mrb[50].mxu1  ;;  %v610_v16 = vpop.f32.mrb[51].mxu0 }
 0x15c   : > { %v866_v17 = vadd.f32 %v865_v15, %v1601_v54  ;;  %v611_v18 = vadd.f32 %v610_v16, %v1603_v7  ;;  %v867_v19 = vpop.f32.mrb[51].mxu1 }
 0x15d   : > { %1007 = vst [vmem:[%s1610_s28 + $0x320] sm:$0xff] %v609_v14  ;;  %v868_v20 = vadd.f32 %v867_v19, %v1605_v55 }
 0x15e   : > { %1009 = vst [vmem:[%s1610_s28 + $0x330] sm:$0xff] %v866_v17  ;;  %1008 = vst [vmem:[%s1610_s28 + $0x328] sm:$0xff] %v611_v18  ;;  %v614_v21 = vpop.f32.mrb[52].mxu0 }
 0x15f   : > { %1010 = vst.msk [vmem:[%s1610_s28 + $0x338] sm:$0xff] %vm909_vm2, %v868_v20  ;;  %v615_v22 = vadd.f32 %v614_v21, %v1599_v53  ;;  %v871_v23 = vpop.f32.mrb[52].mxu1  ;;  %v616_v24 = vpop.f32.mrb[53].mxu0 }
 0x160   : > { %v872_v25 = vadd.f32 %v871_v23, %v1601_v54  ;;  %v617_v26 = vadd.f32 %v616_v24, %v1603_v7  ;;  %v873_v27 = vpop.f32.mrb[53].mxu1 }
 0x161   : > { %1011 = vst [vmem:[%s1610_s28 + $0x340] sm:$0xff] %v615_v22  ;;  %v874_v28 = vadd.f32 %v873_v27, %v1605_v55 }
 0x162   : > { %1013 = vst [vmem:[%s1610_s28 + $0x350] sm:$0xff] %v872_v25  ;;  %1012 = vst [vmem:[%s1610_s28 + $0x348] sm:$0xff] %v617_v26  ;;  %v620_v29 = vpop.f32.mrb[54].mxu0 }
 0x163   : > { %1014 = vst.msk [vmem:[%s1610_s28 + $0x358] sm:$0xff] %vm909_vm2, %v874_v28  ;;  %v621_v30 = vadd.f32 %v620_v29, %v1599_v53  ;;  %v877_v31 = vpop.f32.mrb[54].mxu1  ;;  %v622_v32 = vpop.f32.mrb[55].mxu0 }
 0x164   : > { %v878_v33 = vadd.f32 %v877_v31, %v1601_v54  ;;  %v623_v34 = vadd.f32 %v622_v32, %v1603_v7  ;;  %v879_v35 = vpop.f32.mrb[55].mxu1 }
 0x165   : > { %1015 = vst [vmem:[%s1610_s28 + $0x360] sm:$0xff] %v621_v30  ;;  %v880_v36 = vadd.f32 %v879_v35, %v1605_v55 }
 0x166   : > { %1017 = vst [vmem:[%s1610_s28 + $0x370] sm:$0xff] %v878_v33  ;;  %1016 = vst [vmem:[%s1610_s28 + $0x368] sm:$0xff] %v623_v34  ;;  %v626_v37 = vpop.f32.mrb[56].mxu0 }
 0x167   : > { %1018 = vst.msk [vmem:[%s1610_s28 + $0x378] sm:$0xff] %vm909_vm2, %v880_v36  ;;  %v627_v38 = vadd.f32 %v626_v37, %v1599_v53  ;;  %v883_v39 = vpop.f32.mrb[56].mxu1  ;;  %v628_v40 = vpop.f32.mrb[57].mxu0 }
 0x168   : > { %v884_v41 = vadd.f32 %v883_v39, %v1601_v54  ;;  %v629_v42 = vadd.f32 %v628_v40, %v1603_v7  ;;  %v885_v43 = vpop.f32.mrb[57].mxu1 }
 0x169   : > { %1019 = vst [vmem:[%s1610_s28 + $0x380] sm:$0xff] %v627_v38  ;;  %v886_v44 = vadd.f32 %v885_v43, %v1605_v55 }
 0x16a   : > { %1021 = vst [vmem:[%s1610_s28 + $0x390] sm:$0xff] %v884_v41  ;;  %1020 = vst [vmem:[%s1610_s28 + $0x388] sm:$0xff] %v629_v42  ;;  %v632_v45 = vpop.f32.mrb[58].mxu0 }
 0x16b   : > { %1022 = vst.msk [vmem:[%s1610_s28 + $0x398] sm:$0xff] %vm909_vm2, %v886_v44  ;;  %v633_v46 = vadd.f32 %v632_v45, %v1599_v53  ;;  %v889_v47 = vpop.f32.mrb[58].mxu1  ;;  %v634_v48 = vpop.f32.mrb[59].mxu0 }
 0x16c   : > { %v890_v49 = vadd.f32 %v889_v47, %v1601_v54  ;;  %v635_v50 = vadd.f32 %v634_v48, %v1603_v7  ;;  %v891_v51 = vpop.f32.mrb[59].mxu1 }
 0x16d   : > { %1023 = vst [vmem:[%s1610_s28 + $0x3a0] sm:$0xff] %v633_v46  ;;  %v892_v52 = vadd.f32 %v891_v51, %v1605_v55 }
 0x16e   : > { %1025 = vst [vmem:[%s1610_s28 + $0x3b0] sm:$0xff] %v890_v49  ;;  %1024 = vst [vmem:[%s1610_s28 + $0x3a8] sm:$0xff] %v635_v50  ;;  %v638_v56 = vpop.f32.mrb[60].mxu0 }
 0x16f   : > { %1026 = vst.msk [vmem:[%s1610_s28 + $0x3b8] sm:$0xff] %vm909_vm2, %v892_v52  ;;  %v639_v57 = vadd.f32 %v638_v56, %v1599_v53  ;;  %v895_v58 = vpop.f32.mrb[60].mxu1  ;;  %v640_v59 = vpop.f32.mrb[61].mxu0 }
 0x170   : > { %v896_v60 = vadd.f32 %v895_v58, %v1601_v54  ;;  %v641_v61 = vadd.f32 %v640_v59, %v1603_v7  ;;  %v897_v62 = vpop.f32.mrb[61].mxu1 }
 0x171   : > { %1027 = vst [vmem:[%s1610_s28 + $0x3c0] sm:$0xff] %v639_v57  ;;  %v898_v63 = vadd.f32 %v897_v62, %v1605_v55 }
 0x172   : > { %1029 = vst [vmem:[%s1610_s28 + $0x3d0] sm:$0xff] %v896_v60  ;;  %1028 = vst [vmem:[%s1610_s28 + $0x3c8] sm:$0xff] %v641_v61  ;;  %v644_v0 = vpop.f32.mrb[62].mxu0 }
 0x173   : > { %1030 = vst.msk [vmem:[%s1610_s28 + $0x3d8] sm:$0xff] %vm909_vm2, %v898_v63  ;;  %v645_v1 = vadd.f32 %v644_v0, %v1599_v53  ;;  %v901_v2 = vpop.f32.mrb[62].mxu1  ;;  %v646_v3 = vpop.f32.mrb[63].mxu0 }
 0x174   : > { %v902_v4 = vadd.f32 %v901_v2, %v1601_v54  ;;  %v647_v5 = vadd.f32 %v646_v3, %v1603_v7  ;;  %v903_v6 = vpop.f32.mrb[63].mxu1 }
 0x175   : > { %1031 = vst [vmem:[%s1610_s28 + $0x3e0] sm:$0xff] %v645_v1  ;;  %v904_v8 = vadd.f32 %v903_v6, %v1605_v55 }
 0x176   : > { %1033 = vst [vmem:[%s1610_s28 + $0x3f0] sm:$0xff] %v902_v4  ;;  %1032 = vst [vmem:[%s1610_s28 + $0x3e8] sm:$0xff] %v647_v5 }
 0x177   : > { %1034 = vst.msk [vmem:[%s1610_s28 + $0x3f8] sm:$0xff] %vm909_vm2, %v904_v8 }
 0x178 PF: > { %s13_s12 = sadd.s32 1, %s1237_s12  }
 0x179   : > { %p10_p4 = scmp.ge.s32.totalorder %s13_s12, 4  }
 0x17b   :  { %12 = sbr.rel (!%p10_p4) target bundleno = 1 (0x1), region = 62 }

</bundles_post_ra>
